<compile_context>
chip_gen: v7x
topology: tpu7x:2x2x1
jax: 0.10.0
libtpu: 0.0.40
codegen_flags: <defaults>
</compile_context>

<pallas_src>
import functools
import math

import jax
import jax.numpy as jnp
from jax.experimental import pallas as pl
from jax.experimental.pallas import tpu as pltpu


def _conv1d_gn_mish_kernel(x_ref, w_ref, b_ref, gamma_ref, beta_ref, g_ref,
                           o_ref, *, l_out: int, cpg: int, eps: float):
    """One grid step = (batch tile i, channel block j).

    x_ref:     (Bt, Lp, K*C_in)   im2col'd activations (rows >= l_out are zero)
    w_ref:     (K*C_in, C_blk)    conv weights, taps folded into the rows
    b_ref:     (1, C_blk)         conv bias (f32)
    gamma_ref: (1, C_blk)         GroupNorm weight (f32)
    beta_ref:  (1, C_blk)         GroupNorm bias (f32)
    g_ref:     (n_groups, C_blk)  group-membership indicator (f32)
    o_ref:     (Bt, Lp, C_blk)
    """
    Bt, Lp, KC = x_ref.shape
    C_blk = o_ref.shape[2]

    # ---- Conv1d: one MXU matmul per step (taps live in the contraction dim).
    x2 = x_ref[...].reshape(Bt * Lp, KC)
    y = jnp.dot(x2, w_ref[...],
                preferred_element_type=jnp.float32).reshape(Bt, Lp, C_blk)

    bias = b_ref[...].astype(jnp.float32)        # (1, C_blk)
    gamma = gamma_ref[...].astype(jnp.float32)
    beta = beta_ref[...].astype(jnp.float32)
    G = g_ref[...]                               # (n_groups, C_blk), f32
    inv_n = 1.0 / float(cpg * l_out)

    # ---- GroupNorm, batched over Bt (two-pass: mean, then centered var).
    # Conv bias folded analytically: y_true = y + bias is never materialized.
    ch_sum = jnp.sum(y, axis=1) + float(l_out) * bias             # (Bt, C_blk)
    g_sum = jax.lax.dot_general(ch_sum, G, (((1,), (1,)), ((), ())),
                                preferred_element_type=jnp.float32)
    mean = jnp.dot(g_sum * inv_n, G,
                   preferred_element_type=jnp.float32)            # (Bt, C_blk)

    m0 = mean - bias                              # offset to subtract from raw conv out
    c = y - m0[:, None, :]                        # centered activations, f32
    ch_var = jnp.sum(c * c, axis=1)               # (Bt, C_blk)
    n_pad_rows = Lp - l_out
    if n_pad_rows:
        # Padded rows have y == 0, so each contributed (-m0)^2; remove exactly.
        ch_var = ch_var - float(n_pad_rows) * (m0 * m0)
    g_var = jax.lax.dot_general(ch_var, G, (((1,), (1,)), ((), ())),
                                preferred_element_type=jnp.float32)
    var = jnp.dot(g_var * inv_n, G, preferred_element_type=jnp.float32)
    var = jnp.maximum(var, 0.0)

    scale = gamma * jax.lax.rsqrt(var + eps)      # (Bt, C_blk)
    z = c * scale[:, None, :] + beta              # normalized + affine

    # ---- Mish: z * tanh(softplus(z)) with one exp; the divide lands on EUP.
    e = jnp.exp(jnp.minimum(z, 20.0))
    t = (1.0 + e) * (1.0 + e)
    mish = z * ((t - 1.0) / (t + 1.0))
    mish = jnp.where(z > 20.0, z, mish)           # saturated region is exact

    o_ref[...] = mish.astype(o_ref.dtype)


def conv1d_block(x, w, b, gamma, beta, *, n_groups, eps=1e-5, mxu_dtype=None):
    """x: (B, C_in, L); w: (C_out, C_in, K); b/gamma/beta: (C_out,).

    Matches torch Conv1d(padding=K//2) -> GroupNorm(n_groups) -> Mish and
    returns (B, C_out, L_out).  `mxu_dtype` (e.g. jnp.bfloat16) optionally
    narrows the MXU operands; off by default for strict f32 parity.
    """
    B, C_in, L = x.shape
    C_out, C_in_w, K = w.shape
    assert C_in_w == C_in
    assert C_out % n_groups == 0
    cpg = C_out // n_groups
    pad = K // 2
    L_out = L + 2 * pad - K + 1

    LANE, SUB = 128, 8
    C_pad = -(-C_out // LANE) * LANE
    Lp = -(-L_out // SUB) * SUB

    # Channel block for grid axis 1: whole GroupNorm groups per block, lane
    # aligned (prefer 256-multiples for the v6e/v7x 256-wide MXU).
    C_blk = C_pad
    for lane_mult in (256, LANE):
        cand = (cpg * lane_mult) // math.gcd(cpg, lane_mult)
        if cand <= C_pad and C_pad % cand == 0:
            C_blk = cand
            break
    n_cblk = C_pad // C_blk

    KC = K * C_in
    compute_dtype = jnp.dtype(mxu_dtype) if mxu_dtype is not None else jnp.dtype(x.dtype)
    itemsize = compute_dtype.itemsize

    # Batch tile: largest divisor of B whose per-step buffers fit a conservative
    # VMEM budget, but keep >= 2 grid steps (v7x megacore + pipeline overlap).
    def per_bt_bytes(d):
        return d * Lp * (2 * KC * itemsize        # x_col double buffer
                         + 2 * C_blk * itemsize   # output double buffer
                         + 2 * C_blk * 4)         # f32 y + centered slab

    divisors = [d for d in range(1, B + 1) if B % d == 0]
    Bt = 1
    for d in divisors:
        if per_bt_bytes(d) <= 24 * 1024 * 1024 and d * Lp <= 4096:
            Bt = d
    while Bt > 1 and (B // Bt) * n_cblk < 2:
        Bt = max(d for d in divisors if d < Bt)

    # ---- wrapper-side im2col (K*C_in is small, so the K x HBM re-read of x is
    # negligible and all in-kernel shuffle work disappears).
    # TODO(synk): for large K*C_in switch to K per-tap matmuls accumulated in
    # VMEM instead of materializing x_col in HBM.
    x_p = jnp.pad(x, ((0, 0), (0, 0), (pad, pad)))
    cols = [jax.lax.slice_in_dim(x_p, k, k + L_out, axis=2) for k in range(K)]
    x_col = jnp.transpose(jnp.concatenate(cols, axis=1), (0, 2, 1))  # (B, L_out, K*C_in)
    if Lp > L_out:
        x_col = jnp.pad(x_col, ((0, 0), (0, Lp - L_out), (0, 0)))
    x_col = x_col.astype(compute_dtype)

    # Flatten conv weights: w_flat[k*C_in + ci, co] = w[co, ci, k]; pad C_out.
    w_flat = jnp.transpose(w, (2, 1, 0)).reshape(KC, C_out)
    w_flat = jnp.pad(w_flat, ((0, 0), (0, C_pad - C_out))).astype(compute_dtype)

    b_p = jnp.pad(b, (0, C_pad - C_out)).reshape(1, C_pad).astype(jnp.float32)
    gamma_p = jnp.pad(gamma, (0, C_pad - C_out)).reshape(1, C_pad).astype(jnp.float32)
    beta_p = jnp.pad(beta, (0, C_pad - C_out)).reshape(1, C_pad).astype(jnp.float32)

    # Group-membership indicator; padded channels belong to no group.
    ch = jnp.arange(C_pad)
    grp = jnp.arange(n_groups)
    G = (((ch[None, :] // cpg) == grp[:, None]) &
         (ch[None, :] < C_out)).astype(jnp.float32)              # (n_groups, C_pad)

    # VMEM limit from the actual per-step buffers, capped v7x-safe (<= 48 MiB).
    vmem_est = (per_bt_bytes(Bt)
                + 2 * KC * C_blk * itemsize
                + (3 + n_groups) * C_blk * 4)
    vmem_limit = int(min(48 * 2**20, max(32 * 2**20, 2 * vmem_est)))

    kernel = functools.partial(_conv1d_gn_mish_kernel,
                               l_out=L_out, cpg=cpg, eps=eps)
    out_p = pl.pallas_call(
        kernel,
        out_shape=jax.ShapeDtypeStruct((B, Lp, C_pad), x.dtype),
        grid=(B // Bt, n_cblk),
        in_specs=[
            pl.BlockSpec((Bt, Lp, KC), lambda i, j: (i, 0, 0)),
            pl.BlockSpec((KC, C_blk), lambda i, j: (0, j)),
            pl.BlockSpec((1, C_blk), lambda i, j: (0, j)),
            pl.BlockSpec((1, C_blk), lambda i, j: (0, j)),
            pl.BlockSpec((1, C_blk), lambda i, j: (0, j)),
            pl.BlockSpec((n_groups, C_blk), lambda i, j: (0, j)),
        ],
        out_specs=pl.BlockSpec((Bt, Lp, C_blk), lambda i, j: (i, 0, j)),
        compiler_params=pltpu.CompilerParams(
            dimension_semantics=("parallel", "parallel"),
            vmem_limit_bytes=vmem_limit),
    )(x_col, w_flat, b_p, gamma_p, beta_p, G)

    # TODO(synk): when stacking Conv1dBlocks keep activations in (B, L, C) and
    # drop these boundary transposes / the channel-pad slice from the hot path.
    return jnp.transpose(out_p[:, :L_out, :C_out], (0, 2, 1))


def conv1d_block_ref(x, w, b, gamma, beta, *, n_groups, eps=1e-5):
    """Pure-JAX reference matching torch Conv1d + GroupNorm + Mish."""
    K = w.shape[2]
    y = jax.lax.conv_general_dilated(
        x, w, window_strides=(1,), padding=[(K // 2, K // 2)],
        dimension_numbers=("NCH", "OIH", "NCH"))
    y = y + b[None, :, None]
    B, C, L = y.shape
    yg = y.reshape(B, n_groups, C // n_groups, L)
    mean = yg.mean(axis=(2, 3), keepdims=True)
    var = yg.var(axis=(2, 3), keepdims=True)
    yn = ((yg - mean) * jax.lax.rsqrt(var + eps)).reshape(B, C, L)
    yn = yn * gamma[None, :, None] + beta[None, :, None]
    return yn * jnp.tanh(jax.nn.softplus(yn))


if __name__ == "__main__":
    # Small shapes consistent with Conv1dBlock(4, 8, kernel_size=3, n_groups=8)
    B, C_in, C_out, K, L, n_groups = 2, 4, 8, 3, 16, 8

    key = jax.random.PRNGKey(0)
    kx, kw, kb = jax.random.split(key, 3)

    x = jax.random.normal(kx, (B, C_in, L), dtype=jnp.float32)

    bound = 1.0 / (C_in * K) ** 0.5
    w = jax.random.uniform(kw, (C_out, C_in, K), jnp.float32, -bound, bound)
    b = jax.random.uniform(kb, (C_out,), jnp.float32, -bound, bound)
    gamma = jnp.ones((C_out,), jnp.float32)   # GroupNorm affine weight
    beta = jnp.zeros((C_out,), jnp.float32)   # GroupNorm affine bias

    out = conv1d_block(x, w, b, gamma, beta, n_groups=n_groups)
    out = jax.block_until_ready(out)

    ref = conv1d_block_ref(x, w, b, gamma, beta, n_groups=n_groups)
    assert out.shape == (B, C_out, L), out.shape
    assert jnp.allclose(out, ref, atol=1e-4, rtol=1e-4), \
        float(jnp.max(jnp.abs(out - ref)))

    print("KERNEL_OK")
</pallas_src>

<mosaic_0001>
module attributes {stable_mosaic.version = 11 : i64} {
  func.func @_conv1d_gn_mish_kernel(%arg0: i32, %arg1: i32, %arg2: memref<1x16x12xf32, #tpu.memory_space<vmem>>, %arg3: memref<12x128xf32, #tpu.memory_space<vmem>>, %arg4: memref<1x128xf32, #tpu.memory_space<vmem>>, %arg5: memref<1x128xf32, #tpu.memory_space<vmem>>, %arg6: memref<1x128xf32, #tpu.memory_space<vmem>>, %arg7: memref<8x128xf32, #tpu.memory_space<vmem>>, %arg8: memref<1x16x128xf32, #tpu.memory_space<vmem>>) attributes {dimension_semantics = [#tpu.dimension_semantics<parallel>, #tpu.dimension_semantics<parallel>], iteration_bounds = array<i64: 2, 1>, scalar_prefetch = 0 : i64, scratch_operands = 0 : i64, tpu.core_type = #tpu.core_type<tc>, window_params = [{transform_indices = @transform_0, window_bounds = array<i64: 1, 16, 12>}, {transform_indices = @transform_1, window_bounds = array<i64: 12, 128>}, {transform_indices = @transform_2, window_bounds = array<i64: 1, 128>}, {transform_indices = @transform_3, window_bounds = array<i64: 1, 128>}, {transform_indices = @transform_4, window_bounds = array<i64: 1, 128>}, {transform_indices = @transform_5, window_bounds = array<i64: 8, 128>}, {transform_indices = @transform_6, window_bounds = array<i64: 1, 16, 128>}]} {
    %c0 = arith.constant 0 : index
    %c0_0 = arith.constant 0 : index
    %c0_1 = arith.constant 0 : index
    %0 = vector.load %arg2[%c0, %c0_0, %c0_1] : memref<1x16x12xf32, #tpu.memory_space<vmem>>, vector<1x16x12xf32>
    %1 = vector.shape_cast %0 : vector<1x16x12xf32> to vector<16x12xf32>
    %c0_2 = arith.constant 0 : index
    %c0_3 = arith.constant 0 : index
    %2 = vector.load %arg3[%c0_2, %c0_3] : memref<12x128xf32, #tpu.memory_space<vmem>>, vector<12x128xf32>
    %cst = arith.constant dense<0.000000e+00> : vector<16x128xf32>
    %3 = tpu.matmul %1, %2, %cst {dimension_numbers = #tpu.dot_dimension_numbers<[1], [0], [0], [1], [0, 0, 1, 1], [], []>} : vector<16x12xf32>, vector<12x128xf32>, vector<16x128xf32> -> vector<16x128xf32>
    %4 = vector.shape_cast %3 : vector<16x128xf32> to vector<1x16x128xf32>
    %c0_4 = arith.constant 0 : index
    %c0_5 = arith.constant 0 : index
    %5 = vector.load %arg4[%c0_4, %c0_5] : memref<1x128xf32, #tpu.memory_space<vmem>>, vector<1x128xf32>
    %c0_6 = arith.constant 0 : index
    %c0_7 = arith.constant 0 : index
    %6 = vector.load %arg5[%c0_6, %c0_7] : memref<1x128xf32, #tpu.memory_space<vmem>>, vector<1x128xf32>
    %c0_8 = arith.constant 0 : index
    %c0_9 = arith.constant 0 : index
    %7 = vector.load %arg6[%c0_8, %c0_9] : memref<1x128xf32, #tpu.memory_space<vmem>>, vector<1x128xf32>
    %c0_10 = arith.constant 0 : index
    %c0_11 = arith.constant 0 : index
    %8 = vector.load %arg7[%c0_10, %c0_11] : memref<8x128xf32, #tpu.memory_space<vmem>>, vector<8x128xf32>
    %cst_12 = arith.constant dense<0.000000e+00> : vector<1x128xf32>
    %9 = vector.multi_reduction <add>, %4, %cst_12 [1] : vector<1x16x128xf32> to vector<1x128xf32>
    %cst_13 = arith.constant 1.600000e+01 : f32
    %10 = vector.broadcast %cst_13 : f32 to vector<1x128xf32>
    %11 = arith.mulf %10, %5 : vector<1x128xf32>
    %12 = arith.addf %9, %11 : vector<1x128xf32>
    %cst_14 = arith.constant dense<0.000000e+00> : vector<1x8xf32>
    %13 = tpu.matmul %12, %8, %cst_14 {dimension_numbers = #tpu.dot_dimension_numbers<[1], [1], [0], [0], [0, 0, 1, 0], [], []>} : vector<1x128xf32>, vector<8x128xf32>, vector<1x8xf32> -> vector<1x8xf32>
    %cst_15 = arith.constant 6.250000e-02 : f32
    %14 = vector.broadcast %cst_15 : f32 to vector<1x8xf32>
    %15 = arith.mulf %13, %14 : vector<1x8xf32>
    %cst_16 = arith.constant dense<0.000000e+00> : vector<1x128xf32>
    %16 = tpu.matmul %15, %8, %cst_16 {dimension_numbers = #tpu.dot_dimension_numbers<[1], [0], [0], [1], [0, 0, 1, 1], [], []>} : vector<1x8xf32>, vector<8x128xf32>, vector<1x128xf32> -> vector<1x128xf32>
    %17 = arith.subf %16, %5 : vector<1x128xf32>
    %18 = vector.shape_cast %17 : vector<1x128xf32> to vector<1x1x128xf32>
    %19 = vector.broadcast %18 : vector<1x1x128xf32> to vector<1x16x128xf32>
    %20 = arith.subf %4, %19 : vector<1x16x128xf32>
    %21 = arith.mulf %20, %20 : vector<1x16x128xf32>
    %cst_17 = arith.constant dense<0.000000e+00> : vector<1x128xf32>
    %22 = vector.multi_reduction <add>, %21, %cst_17 [1] : vector<1x16x128xf32> to vector<1x128xf32>
    %cst_18 = arith.constant dense<0.000000e+00> : vector<1x8xf32>
    %23 = tpu.matmul %22, %8, %cst_18 {dimension_numbers = #tpu.dot_dimension_numbers<[1], [1], [0], [0], [0, 0, 1, 0], [], []>} : vector<1x128xf32>, vector<8x128xf32>, vector<1x8xf32> -> vector<1x8xf32>
    %cst_19 = arith.constant 6.250000e-02 : f32
    %24 = vector.broadcast %cst_19 : f32 to vector<1x8xf32>
    %25 = arith.mulf %23, %24 : vector<1x8xf32>
    %cst_20 = arith.constant dense<0.000000e+00> : vector<1x128xf32>
    %26 = tpu.matmul %25, %8, %cst_20 {dimension_numbers = #tpu.dot_dimension_numbers<[1], [0], [0], [1], [0, 0, 1, 1], [], []>} : vector<1x8xf32>, vector<8x128xf32>, vector<1x128xf32> -> vector<1x128xf32>
    %cst_21 = arith.constant 0.000000e+00 : f32
    %27 = vector.broadcast %cst_21 : f32 to vector<1x128xf32>
    %28 = arith.maximumf %26, %27 : vector<1x128xf32>
    %cst_22 = arith.constant 9.99999974E-6 : f32
    %29 = vector.broadcast %cst_22 : f32 to vector<1x128xf32>
    %30 = arith.addf %28, %29 : vector<1x128xf32>
    %31 = math.rsqrt %30 : vector<1x128xf32>
    %32 = arith.mulf %6, %31 : vector<1x128xf32>
    %33 = vector.shape_cast %32 : vector<1x128xf32> to vector<1x1x128xf32>
    %34 = vector.broadcast %33 : vector<1x1x128xf32> to vector<1x16x128xf32>
    %35 = arith.mulf %20, %34 : vector<1x16x128xf32>
    %36 = vector.shape_cast %7 : vector<1x128xf32> to vector<1x1x128xf32>
    %37 = vector.broadcast %36 : vector<1x1x128xf32> to vector<1x16x128xf32>
    %38 = arith.addf %35, %37 : vector<1x16x128xf32>
    %cst_23 = arith.constant 2.000000e+01 : f32
    %39 = vector.broadcast %cst_23 : f32 to vector<1x16x128xf32>
    %40 = arith.minimumf %38, %39 : vector<1x16x128xf32>
    %41 = math.exp %40 : vector<1x16x128xf32>
    %cst_24 = arith.constant 1.000000e+00 : f32
    %42 = vector.broadcast %cst_24 : f32 to vector<1x16x128xf32>
    %43 = arith.addf %42, %41 : vector<1x16x128xf32>
    %cst_25 = arith.constant 1.000000e+00 : f32
    %44 = vector.broadcast %cst_25 : f32 to vector<1x16x128xf32>
    %45 = arith.addf %44, %41 : vector<1x16x128xf32>
    %46 = arith.mulf %43, %45 : vector<1x16x128xf32>
    %cst_26 = arith.constant 1.000000e+00 : f32
    %47 = vector.broadcast %cst_26 : f32 to vector<1x16x128xf32>
    %48 = arith.subf %46, %47 : vector<1x16x128xf32>
    %cst_27 = arith.constant 1.000000e+00 : f32
    %49 = vector.broadcast %cst_27 : f32 to vector<1x16x128xf32>
    %50 = arith.addf %46, %49 : vector<1x16x128xf32>
    %51 = arith.divf %48, %50 : vector<1x16x128xf32>
    %52 = arith.mulf %38, %51 : vector<1x16x128xf32>
    %cst_28 = arith.constant 2.000000e+01 : f32
    %53 = vector.broadcast %cst_28 : f32 to vector<1x16x128xf32>
    %54 = arith.cmpf ogt, %38, %53 : vector<1x16x128xf32>
    %55 = arith.select %54, %38, %52 : vector<1x16x128xi1>, vector<1x16x128xf32>
    %c0_29 = arith.constant 0 : index
    %c0_30 = arith.constant 0 : index
    %c0_31 = arith.constant 0 : index
    %56 = vector.load %arg8[%c0_29, %c0_30, %c0_31] : memref<1x16x128xf32, #tpu.memory_space<vmem>>, vector<1x16x128xf32>
    tpu.vector_store %arg8[%c0_29, %c0_30, %c0_31], %55 {strides = array<i32>} : memref<1x16x128xf32, #tpu.memory_space<vmem>>, vector<1x16x128xf32>,
    return
  }
  func.func @transform_0(%arg0: i32, %arg1: i32) -> (i32, i32, i32) {
    %c0_i32 = arith.constant 0 : i32
    %c0_i32_0 = arith.constant 0 : i32
    %c0_i32_1 = arith.constant 0 : i32
    return %arg0, %c0_i32, %c0_i32_0 : i32, i32, i32
  }
  func.func @transform_1(%arg0: i32, %arg1: i32) -> (i32, i32) {
    %c0_i32 = arith.constant 0 : i32
    %c0_i32_0 = arith.constant 0 : i32
    return %c0_i32, %arg1 : i32, i32
  }
  func.func @transform_2(%arg0: i32, %arg1: i32) -> (i32, i32) {
    %c0_i32 = arith.constant 0 : i32
    %c0_i32_0 = arith.constant 0 : i32
    return %c0_i32, %arg1 : i32, i32
  }
  func.func @transform_3(%arg0: i32, %arg1: i32) -> (i32, i32) {
    %c0_i32 = arith.constant 0 : i32
    %c0_i32_0 = arith.constant 0 : i32
    return %c0_i32, %arg1 : i32, i32
  }
  func.func @transform_4(%arg0: i32, %arg1: i32) -> (i32, i32) {
    %c0_i32 = arith.constant 0 : i32
    %c0_i32_0 = arith.constant 0 : i32
    return %c0_i32, %arg1 : i32, i32
  }
  func.func @transform_5(%arg0: i32, %arg1: i32) -> (i32, i32) {
    %c0_i32 = arith.constant 0 : i32
    %c0_i32_0 = arith.constant 0 : i32
    return %c0_i32, %arg1 : i32, i32
  }
  func.func @transform_6(%arg0: i32, %arg1: i32) -> (i32, i32, i32) {
    %c0_i32 = arith.constant 0 : i32
    %c0_i32_0 = arith.constant 0 : i32
    return %arg0, %c0_i32, %arg1 : i32, i32, i32
  }
}

</mosaic_0001>

<bundles_post_ra>
// kernel: tpu_custom_call.1
= control target key start
LH: loop header
LB: loop body
LE: loop exit
PB: predicated region body
PF: predicated region fallthrough
CT: control target
= control target key end

     0   :  { %11 = vsyncpa [#allocation3], 0  ;;  %s1350_s0 = inlined_call_operand.vmem [shape: f32[2,16,12], index: 0, kind: input, shape index: {}]   ;;  %s1351_s1 = inlined_call_operand.vmem [shape: f32[12,128], index: 1, kind: input, shape index: {}]   ;;  %s1352_s2 = inlined_call_operand.vmem [shape: f32[1,128], index: 2, kind: input, shape index: {}]   ;;  %s1353_s3 = inlined_call_operand.vmem [shape: f32[1,128], index: 3, kind: input, shape index: {}]   ;;  %s1354_s4 = inlined_call_operand.vmem [shape: f32[1,128], index: 4, kind: input, shape index: {}]   ;;  %s1355_s5 = inlined_call_operand.vmem [shape: f32[8,128], index: 5, kind: input, shape index: {}]   ;;  %s1356_s6 = inlined_call_operand.hbm [shape: f32[2,16,128], index: 6, kind: output, shape index: {}]  }
   0x1   :  { %13 = vsyncpa [#allocation3 + $0x1], 0  ;;  %s1211_s21 = smov 0   ;;  %s1213_s22 = smov 0  }
   0x2   :  { %s1215_s23 = smov 0   ;;  %s1217_s24 = smov 0  }
   0x3   :  { %s1219_s25 = smov 0   ;;  %s1221_s26 = smov 0  }
   0x4 LB: > { %s947_s27 = sadd.s32 4294967295, %s1168_s26   ;;  %s948_s28 = sadd.s32 4294967294, %s1168_s26   ;;  %s1168_s26 = sphi %s1221_s26, %s19_s26   ;;  %s1164_s25 = sphi %s1219_s25, %s1363_s25   ;;  %s1160_s24 = sphi %s1217_s24, %s1362_s24   ;;  %s1156_s23 = sphi %s1215_s23, %s1361_s23   ;;  %s1152_s22 = sphi %s1213_s22, %s1360_s22   ;;  %s1148_s21 = sphi %s1211_s21, %s1359_s21  }
   0x5   : > { %s31_s29 = sadd.s32 1, %s1164_s25  ;;  %s196_s30 = sadd.s32 1, %s1156_s23 }
   0x6   : > { %p33_p0 = scmp.ge.s32.totalorder %s31_s29, 2  ;;  %p206_p1 = scmp.ne.s32.totalorder %s1156_s23, %s1152_s22 }
   0x7   : > { %p207_p2 = scmp.eq.s32.totalorder %s947_s27, 1  ;;  %p212_p3 = scmp.ne.s32.totalorder %s1152_s22, %s1148_s21 }
   0x8   : > { %s1365_s29 = smov (%p33_p0, %s31_s29), 0  ;;  %p213_p5 = scmp.eq.s32.totalorder %s948_s28, 1 }
   0x9   : > { %p1251_p4 = por %p207_p2, %p206_p1  ;;  %s191_s8 = ssub.s32 %s1164_s25, %s1365_s29 }
   0xa   : > { %p956_p6 = scmp.ge.s32.totalorder %s1168_s26, 1  ;;  %p194_p7 = scmp.eq.s32.totalorder %s191_s8, 0 }
   0xb   : > { %p1258_p8 = por %p213_p5, %p212_p3  ;;  %p271_p9 = scmp.lt.s32.totalorder %s1168_s26, 3 }
   0xc   : > { %s1264_s10 = scalar_select %p194_p7, %s1156_s23, %s196_s30  }
   0xd   : > { %p272_p10 = pnand %p956_p6, %p271_p9 }
   0xe   : > { %v342_v0 = vld [vmem:[%s1351_s1] sm:$0xff] (!%p272_p10)  ;;  %v343_v1 = vld [vmem:[%s1351_s1 + $0x8] sm:$0xf] (!%p272_p10)  ;;  %vm351_vm0 = vcmask (!%p272_p10), 1043456   ;;  %p318_p11 = scmp.lt.s32.totalorder (!%p272_p10), %s1160_s24, 1  ;;  %vm1170_vm1 = vmmov (!%p272_p10), 1   ;;  %v589_v22 = vlaneseq (!%p272_p10) }
   0xf   : > { %275 = sbr.rel (%p272_p10) target bundleno = 1207 (0x4b7), region = 44  ;;  %v1014_v2 = vpack.c.bf16 (!%p272_p10), %v343_v1, %v342_v0  ;;  %vm1015_vm2 = vmpackc.low (!%p272_p10), %vm351_vm0, %vm1170_vm1  ;;  %vm344_vm3 = vcmask (!%p272_p10), 97280   ;;  %v433_v5 = vld [vmem:[%s1355_s5] sm:$0xff] (!%p272_p10)  ;;  %v1171_v6 = vmov (!%p272_p10), 0.0   ;;  %vm1172_vm4 = vmmov (!%p272_p10), 0   ;;  %s315_s14 = sand.u32 (!%p272_p10), 1, %s1152_s22  }
  0x10   : > { %994 = vmatprep.subr.mxu1 (!%p272_p10), %v1171_v6  ;;  %996 = vmatprep.mubr.msk.f32.mxu1 (!%p272_p10), %vm1172_vm4, %v1171_v6  ;;  %v430_v13 = vld [vmem:[%s1352_s2] sm:$0x1] (!%p272_p10)  ;;  %vm514_vm5 = vcmask (!%p272_p10), 64512   ;;  %v590_v23 = vshrl.u32 (!%p272_p10), %v589_v22, 7  ;;  %s1173_s30 = smov (!%p272_p10), [#allocation2]  }
  0x11   : > { %1016 = vmatprep.subr.msk.bf16.mxu0 (!%p272_p10), %vm1015_vm2, %v1014_v2  ;;  %995 = vmatpush3.xpose.msra.mxu1 (!%p272_p10), %v433_v5  ;;  %v441_v16 = vmul.f32 (!%p272_p10), 16.0, %v430_v13  ;;  %v431_v47 = vld [vmem:[%s1353_s3] sm:$0x1] (!%p272_p10)  ;;  %s1094_s8 = sshll.u32 (!%p272_p10), %s1173_s30, 4  ;;  %s1095_s8 = int_to_ptr.vmem [resolvable:$false] %s1094_s8 }
  0x12   : > { %1019 = vmatpush3.bf16.msk.msra.mxu0 (!%p272_p10), %vm1015_vm2, %v1014_v2  ;;  %1004 = vmatprep.subr.mxu1 (!%p272_p10), %v1171_v6  ;;  %v591_v24 = vsub.s32 (!%p272_p10), 0, %v590_v23  ;;  %v965_v51 = vld [vmem:[%s1354_s4] ss:$0 sm:$0xff] (!%p272_p10)  ;;  %s1096_s11 = scalar_lea.vmem (!%p272_p10), %s1095_s8, 512 }
  0x13   : > { %999 = vmatprep.subr.mxu0 (!%p272_p10), %v1171_v6 }
  0x16   : > { %s319_s15 = scalar_select %p318_p11, %s1160_s24, 1 }
  0x18   : > { %s973_s16 = sshll.u32 %s319_s15, 4  ;;  %s957_s15 = sshll.u32 %s315_s14, 4 }
  0x19   : > { %s322_s19 = scalar_lea.vmem %s1350_s0, %s973_s16  ;;  %s974_s16 = sshll.u32 %s1160_s24, 8 }
  0x1a   : > { %v340_v3 = vld [vmem:[%s322_s19] sm:$0xff]  ;;  %v341_v4 = vld [vmem:[%s322_s19 + $0x8] sm:$0xff]  ;;  %s317_s17 = scalar_lea.vmem [#allocation2], %s957_s15  ;;  %s1300_s27 = scalar_lea.hbm %s1356_s6, %s974_s16 }
  0x1b   : > { %991 = vmatprep.mubr.msk.f32.mxu0 %vm344_vm3, %v340_v3  ;;  %s809_s18 = sshll.u32 %s317_s17, 4  ;;  %s1304_s24 = scalar_lea.sflag [#allocation3], %s315_s14  ;;  %s1302_s18 = int_to_ptr.vmem [resolvable:$true] %s809_s18 }
  0x1c   : > { %992 = vmatmul.mubr.msk.f32.vlgmr.msra.gmra.mrb[0].mxu0 %vm344_vm3, %v341_v4  ;;  %s1090_s28 = scalar_lea.vmem %s1302_s18, 256  ;;  %p1097_p1 = scmp.lt.s32.totalorder %s1302_s18, %s1095_s8 }
  0x1d   : > { %1000 = vmatpush3.msra.mxu0 %v433_v5  ;;  %1001 = vmatprep.mubr.msk.f32.mxu0 %vm1172_vm4, %v1171_v6  ;;  %p1091_p12 = scmp.ne.s32.totalorder %s1302_s18, %s1090_s28  ;;  %p1098_p2 = scmp.lt.s32.totalorder %s1096_s11, %s1090_s28 }
  0x1e   : > { %1009 = vmatprep.subr.mxu0 %v1171_v6 }
  0x1f   : > { %p1092_p13 = pnand %p1091_p12, %p1251_p4  ;;  %p1099_p3 = por %p1098_p2, %p1097_p1 }
  0x21   : > { %p1093_p0 = pneg %p1092_p13 }
  0x23   : > { %p1100_p5 = pnand %p1099_p3, %p1093_p0 }
  0xef   : > { %v993_v7 = vpop.f32.mrb[0].mxu0 }
  0xf0   : > { %v421_v8 = vpop.f32.mrb[1].mxu0 }
  0xf1   : > { %v434_v9 = vadd.f32 %v993_v7, %v421_v8 }
  0xf3   : > { %v435_v10 = vrot.slane %v434_v9, 4 }
  0xf5   : > { %v436_v11 = vadd.f32 %v435_v10, %v434_v9 }
  0xf7   : > { %v437_v12 = vrot.slane %v436_v11, 2 }
  0xf9   : > { %v438_v14 = vadd.f32 %v437_v12, %v436_v11 }
  0xfb   : > { %v439_v15 = vrot.slane %v438_v14, 1 }
  0xfd   : > { %v440_v17 = vadd.f32 %v439_v15, %v438_v14 }
  0xff   : > { %v442_v18 = vadd.f32 %v441_v16, %v440_v17 }
 0x101   : > { %997 = vmatmul.mubr.f32.vlgmr.msra.gmra.mrb[0].mxu1 %v442_v18 }
 0x102   : > { %1005 = vmatpush3.xpose.msra.mxu1 %v433_v5  ;;  %1006 = vmatprep.mubr.msk.f32.mxu1 %vm1172_vm4, %v1171_v6 }
 0x1d4   : > { %v509_v19 = vpop.f32.mrb[0].mxu1 }
 0x1d5   : > { %v513_v20 = vmul.f32 0.0625, %v509_v19  ;;  %v998_v21 = vpop.f32.mrb[1].mxu1 }
 0x1d7   : > { %1002 = vmatmul.mubr.msk.f32.vlgmr.msra.gmra.mrb[2].mxu0 %vm514_vm5, %v513_v20 }
 0x1d8   : > { %1010 = vmatpush3.msra.mxu0 %v433_v5  ;;  %1011 = vmatprep.mubr.msk.f32.mxu0 %vm1172_vm4, %v1171_v6 }
 0x2aa   : > { %v584_v25 = vpop.f32.mrb[2].mxu0 }
 0x2ab   : > { %v588_v26 = vsub.f32 %v584_v25, %v430_v13  ;;  %v1003_v27 = vpop.f32.mrb[3].mxu0 }
 0x2ad   : > { %v592_v28 = vrot.slane %v588_v26, %v591_v24 }
 0x2af   : > { %v593_v29 = vsub.f32 %v421_v8, %v592_v28  ;;  %v594_v30 = vsub.f32 %v993_v7, %v592_v28 }
 0x2b1   : > { %v595_v31 = vmul.f32 %v593_v29, %v593_v29  ;;  %v596_v32 = vmul.f32 %v594_v30, %v594_v30 }
 0x2b3   : > { %v597_v33 = vadd.f32 %v596_v32, %v595_v31 }
 0x2b5   : > { %v598_v34 = vrot.slane %v597_v33, 4 }
 0x2b7   : > { %v599_v35 = vadd.f32 %v598_v34, %v597_v33 }
 0x2b9   : > { %v600_v36 = vrot.slane %v599_v35, 2 }
 0x2bb   : > { %v601_v37 = vadd.f32 %v600_v36, %v599_v35 }
 0x2bd   : > { %v602_v38 = vrot.slane %v601_v37, 1 }
 0x2bf   : > { %v603_v39 = vadd.f32 %v602_v38, %v601_v37 }
 0x2c1   : > { %1007 = vmatmul.mubr.f32.vlgmr.msra.gmra.mrb[2].mxu1 %v603_v39 }
 0x394   : > { %v670_v40 = vpop.f32.mrb[2].mxu1 }
 0x395   : > { %v674_v41 = vmul.f32 0.0625, %v670_v40  ;;  %v1008_v42 = vpop.f32.mrb[3].mxu1 }
 0x397   : > { %1012 = vmatmul.mubr.msk.f32.vlgmr.msra.gmra.mrb[4].mxu0 %vm514_vm5, %v674_v41 }
 0x46a   : > { %v744_v43 = vpop.f32.mrb[4].mxu0 }
 0x46b   : > { %v748_v44 = vmax.f32 %v744_v43, 0.0  ;;  %v1013_v45 = vpop.f32.mrb[5].mxu0 }
 0x46d   : > { %v749_v46 = vadd.f32 1e-05, %v748_v44 }
 0x46f   : > { %1080 = vrsqrt.f32 %v749_v46 }
 0x479   : > { %v1081_v48 = vpop.eup %1080 }
 0x47a   : > { %v751_v49 = vmul.f32 %v1081_v48, %v431_v47 }
 0x47c   : > { %v756_v50 = vrot.slane %v751_v49, %v591_v24 }
 0x47e   : > { %v758_v52 = vmul.f32 %v756_v50, %v593_v29  ;;  %v759_v53 = vmul.f32 %v756_v50, %v594_v30 }
 0x480   : > { %v766_v54 = vadd.f32 %v965_v51, %v758_v52  ;;  %v767_v55 = vadd.f32 %v965_v51, %v759_v53 }
 0x482   : > { %v768_v56 = vmin.f32 %v766_v54, 20.0  ;;  %v769_v57 = vmin.f32 %v767_v55, 20.0  ;;  %vm788_vm6 = vcmp.gt.f32.partialorder %v766_v54, 20.0  ;;  %vm789_vm7 = vcmp.gt.f32.partialorder %v767_v55, 20.0 }
 0x484   : > { %v770_v58 = vmul.f32 1.442695, %v768_v56  ;;  %v772_v59 = vmul.f32 1.442695, %v769_v57 }
 0x486   : > { %1082 = vpow2.f32 %v770_v58 }
 0x487   : > { %1084 = vpow2.f32 %v772_v59 }
 0x490   : > { %v1083_v60 = vpop.eup %1082 }
 0x491   : > { %v1085_v61 = vpop.eup %1084  ;;  %v774_v62 = vadd.f32 1.0, %v1083_v60 }
 0x492   : > { %v775_v63 = vadd.f32 1.0, %v1085_v61 }
 0x493   : > { %v776_v0 = vmul.f32 %v774_v62, %v774_v62 }
 0x494   : > { %v777_v1 = vmul.f32 %v775_v63, %v775_v63 }
 0x495   : > { %v780_v2 = vadd.f32 1.0, %v776_v0  ;;  %v966_v4 = vadd.f32 -1.0, %v776_v0 }
 0x496   : > { %v781_v3 = vadd.f32 1.0, %v777_v1  ;;  %v967_v6 = vadd.f32 -1.0, %v777_v1 }
 0x497   : > { %1086 = vrcp.f32 %v780_v2 }
 0x498   : > { %1088 = vrcp.f32 %v781_v3 }
 0x4a1   : > { %v1087_v5 = vpop.eup %1086 }
 0x4a2   : > { %v1089_v7 = vpop.eup %1088  ;;  %v783_v8 = vmul.f32 %v1087_v5, %v966_v4 }
 0x4a3   : > { %v785_v9 = vmul.f32 %v1089_v7, %v967_v6 }
 0x4a4   : > { %v786_v10 = vmul.f32 %v783_v8, %v766_v54 }
 0x4a5   : > { %v787_v11 = vmul.f32 %v785_v9, %v767_v55 }
 0x4a6   : > { %v790_v12 = vsel %vm788_vm6, %v766_v54, %v786_v10 }
 0x4a7   : > { %v791_v13 = vsel %vm789_vm7, %v767_v55, %v787_v11  ;;  %792 = vst [vmem:[%s317_s17] sm:$0xff] %v790_v12 }
 0x4a8   : > { %793 = vst [vmem:[%s317_s17 + $0x8] sm:$0xff] %v791_v13 }
 0x4a9   : > { %1103 = shalt.err (!%p1100_p5)
}
 0x4aa   : > { %s1104_s12 = scalar_lea.hbm %s1300_s27, 256  ;;  %s1108_s15 = scalar_lea.hbm %s1356_s6, 512 }
 0x4ab   : > { %p1105_p6 = scmp.ne.s32.totalorder %s1300_s27, %s1104_s12  ;;  %p1109_p10 = scmp.lt.u32.totalorder %s1300_s27, %s1356_s6 }
 0x4ac   : > { %p1110_p11 = scmp.lt.u32.totalorder %s1108_s15, %s1104_s12  ;;  %p1112_p13 = scmp.lt.u32.totalorder %s1104_s12, %s1300_s27 }
 0x4ad   : > { %p1106_p7 = pnand %p1105_p6, %p1251_p4 }
 0x4ae   : > { %p1111_p12 = por %p1110_p11, %p1109_p10 }
 0x4af   : > { %p1107_p9 = pneg %p1106_p7 }
 0x4b0   : > { %p1113_p0 = por %p1112_p13, %p1111_p12 }
 0x4b2   : > { %p1114_p1 = pnand %p1113_p0, %p1107_p9 }
 0x4b4   : > { %1117 = shalt.err (!%p1114_p1)
}
 0x4b5   : > { %s1174_s19 = smov 128   ;;  %s1175_s20 = smov 8  }
 0x4b6   : > { %1020 = dma.vmem_to_hbm [thread:$0]  (%p1251_p4), %s1302_s18, 256, %s1300_s27, %s1304_s24, %s1174_s19, %s1174_s19, %s1175_s20  }
 0x4b7 PF: > { %p1026_p2 = scmp.ge.s32.totalorder %s1168_s26, 2  ;;  %s824_s28 = sand.u32 1, %s1148_s21  }
 0x4b8   : > { %s825_s30 = scalar_lea.sflag [#allocation3], %s824_s28 }
 0x4b9   : > { %p1023_p3 = pnand %p1026_p2, %p1258_p8 }
 0x4bb   : > { %1143 = dma.done.wait (!%p1023_p3), %s825_s30, 256  }
 0x4bc   : > { %1145 = vsyncadd (!%p1023_p3), %s825_s30, 4294967040  ;;  %s19_s26 = sadd.s32 1, %s1168_s26   ;;  %s1359_s21 = smov %s1152_s22 }
 0x4bd   : > { %p16_p5 = scmp.ge.s32.totalorder %s19_s26, 4   ;;  %s1360_s22 = smov %s1156_s23 }
 0x4be   : > { %s1361_s23 = smov %s1264_s10  ;;  %s1362_s24 = smov %s1164_s25 }
 0x4bf   : > { %s1363_s25 = smov %s1365_s29  ;;  %18 = sbr.rel (!%p16_p5) target bundleno = 4 (0x4), region = 94 }
 0x4c6   :  { %830 = vsyncpa [#allocation3], 1 }
 0x4c7   :  { %832 = vsyncpa [#allocation3 + $0x1], 1 }

</bundles_post_ra>
